<compile_context>
chip_gen: v6e
topology: v6e:2x2x1
jax: 0.10.0
libtpu: 0.0.40
codegen_flags: <defaults>
</compile_context>

<pallas_src>
import functools

import jax
import jax.numpy as jnp
from jax.experimental import pallas as pl
from jax.experimental.pallas import tpu as pltpu


LEAKY_SLOPE = 0.2
LANE = 128


def _round_up(x, m):
    return ((x + m - 1) // m) * m


def _decoder_kernel(x_ref, w1_ref, b1_ref, w2_ref, b2_ref, w3_ref, b3_ref, o_ref):
    """Fused 3-layer MLP: (matmul + bias + LeakyReLU) x2, then final matmul.

    Matmuls run in the weights' dtype (bf16 by default -> native MXU format)
    with f32 accumulation; bias-add and LeakyReLU stay in f32 on the VPU.
    The x tile is cast to the MXU dtype *inside* the kernel (no wrapper pass).
    """
    x = x_ref[...].astype(w1_ref.dtype)

    h1 = jnp.dot(x, w1_ref[...], preferred_element_type=jnp.float32) + b1_ref[...]
    h1 = jnp.maximum(h1, LEAKY_SLOPE * h1)          # LeakyReLU(0.2), single VALU max

    h2 = jnp.dot(h1.astype(w2_ref.dtype), w2_ref[...],
                 preferred_element_type=jnp.float32) + b2_ref[...]
    h2 = jnp.maximum(h2, LEAKY_SLOPE * h2)

    out = jnp.dot(h2.astype(w3_ref.dtype), w3_ref[...],
                  preferred_element_type=jnp.float32) + b3_ref[...]
    o_ref[...] = out.astype(o_ref.dtype)


def prepare_decoder_params(w1, b1, w2, b2, w3, b3, *, use_bf16=True):
    """One-time weight preparation (do NOT call per forward pass).

    Zero-pads the hidden and output dims to lane multiples (128) and casts the
    matmul weights to bf16 (biases stay f32). Zero padding is exact for this
    MLP. Returns (params_tuple, out_dim) where out_dim is the original
    (unpadded) output width.
    """
    L, H1 = w1.shape
    H2 = w2.shape[1]
    O = w3.shape[1]
    H1p, H2p, Op = (_round_up(d, LANE) for d in (H1, H2, O))
    w_dtype = jnp.bfloat16 if use_bf16 else w1.dtype

    # Latent (K) dim of w1 is intentionally NOT padded: x is read unpadded and
    # padding K only burns MXU cycles multiplying zeros.
    w1p = jnp.pad(w1, ((0, 0), (0, H1p - H1))).astype(w_dtype)
    w2p = jnp.pad(w2, ((0, H1p - H1), (0, H2p - H2))).astype(w_dtype)
    w3p = jnp.pad(w3, ((0, H2p - H2), (0, Op - O))).astype(w_dtype)
    b1p = jnp.pad(b1, ((0, 0), (0, H1p - H1))).astype(jnp.float32)
    b2p = jnp.pad(b2, ((0, 0), (0, H2p - H2))).astype(jnp.float32)
    b3p = jnp.pad(b3, ((0, 0), (0, Op - O))).astype(jnp.float32)
    return (w1p, b1p, w2p, b2p, w3p, b3p), O


def _pick_block_m(B, sub):
    """Batch tile: big tiles amortize per-step overhead (~0.35us/step); aim for
    >= 4 grid steps on large batches so both v7x TensorCores get >= 2 pipelined
    steps each (v5e/v6e single-core only need >= 2 steps total)."""
    if B <= 128:
        return max(sub, _round_up(B, sub))
    if B < 512:
        return 128
    return min(512, max(128, ((B // 4) // 128) * 128))


@functools.partial(jax.jit, static_argnames=("out_dim", "block_m"))
def decoder_forward(x, w1, b1, w2, b2, w3, b3, *, out_dim, block_m=None):
    """x: [B, latent] (unpadded, any float dtype); weights/biases as produced by
    prepare_decoder_params. Returns [B, out_dim]."""
    B, L = x.shape
    H1p = w1.shape[1]
    H2p = w2.shape[1]
    Op = w3.shape[1]
    out_dtype = x.dtype
    w_itemsize = jnp.dtype(w1.dtype).itemsize
    x_itemsize = jnp.dtype(out_dtype).itemsize
    use_bf16 = jnp.dtype(w1.dtype) == jnp.dtype(jnp.bfloat16)

    # ---- batch tile ----------------------------------------------------------
    sub = 16 if use_bf16 else 8            # sublane alignment (bf16 packs pairs)
    if block_m is None:
        block_m = _pick_block_m(B, sub)
    block_m = max(sub, _round_up(block_m, sub))
    Bp = _round_up(B, block_m)
    xp = x if Bp == B else jnp.pad(x, ((0, Bp - B), (0, 0)))
    grid = (Bp // block_m,)

    # ---- VMEM budget (weights single-buffered, x/out double-buffered) --------
    wbytes = (L * H1p + H1p * H2p + H2p * Op) * w_itemsize + (H1p + H2p + Op) * 4
    iobytes = 2 * block_m * (L + Op) * x_itemsize
    actbytes = 2 * block_m * (H1p + H2p + Op) * 4
    est = wbytes + iobytes + actbytes
    cp_kwargs = dict(dimension_semantics=("parallel",))
    if est > 12 * 1024 * 1024:
        # Covers v5e's 16 MiB scoped default; capped safely under v7x's 64 MiB
        # physical VMEM (v5e/v6e have 128 MiB, so this is conservative there).
        cp_kwargs["vmem_limit_bytes"] = int(min(est + (4 << 20), 56 << 20))
    compiler_params = pltpu.CompilerParams(**cp_kwargs)

    # ---- advisory cost estimate for XLA scheduling ---------------------------
    flops = 2 * Bp * (L * H1p + H1p * H2p + H2p * Op)
    bytes_accessed = Bp * (L + Op) * x_itemsize + wbytes
    cost = pl.CostEstimate(flops=int(flops), transcendentals=0,
                           bytes_accessed=int(bytes_accessed))

    # Constant-index (weight/bias) blocks: resident across the grid and
    # single-buffered -> half the resident-weight VMEM vs default pipelining.
    def _resident(shape):
        return pl.BlockSpec(shape, lambda i: (0, 0), pipeline_mode=pl.Buffered(1))

    out = pl.pallas_call(
        _decoder_kernel,
        out_shape=jax.ShapeDtypeStruct((Bp, Op), out_dtype),
        grid_spec=pltpu.PrefetchScalarGridSpec(
            num_scalar_prefetch=0,
            grid=grid,
            in_specs=[
                # x: tiled over batch; latent axis uses the full (unpadded) dim.
                pl.BlockSpec((block_m, L), lambda i: (i, 0)),
                _resident((L, H1p)),
                _resident((1, H1p)),
                _resident((H1p, H2p)),
                _resident((1, H2p)),
                _resident((H2p, Op)),
                _resident((1, Op)),
            ],
            # Lane-dense output (Op is a multiple of 128) -> unmasked stores.
            out_specs=pl.BlockSpec((block_m, Op), lambda i: (i, 0)),
        ),
        compiler_params=compiler_params,
        cost_estimate=cost,
    )(xp, w1, b1, w2, b2, w3, b3)

    if Bp != B or Op != out_dim:
        out = out[:B, :out_dim]
    return out


def init_decoder_params(key, latent_dim, output_dim, hidden_dim, dtype=jnp.float32):
    """torch.nn.Linear-style init (uniform +-1/sqrt(fan_in)); weights [in, out]."""
    dims = [(latent_dim, hidden_dim), (hidden_dim, hidden_dim), (hidden_dim, output_dim)]
    params = []
    for fan_in, fan_out in dims:
        key, kw, kb = jax.random.split(key, 3)
        bound = 1.0 / jnp.sqrt(fan_in)
        w = jax.random.uniform(kw, (fan_in, fan_out), dtype, -bound, bound)
        b = jax.random.uniform(kb, (1, fan_out), dtype, -bound, bound)
        params += [w, b]
    return params


def decoder_reference(x, w1, b1, w2, b2, w3, b3, dtype=None):
    """Pure-JAX reference (matches PyTorch nn.Sequential semantics).

    If `dtype` is given, matmul operands are cast to it (f32 accumulation),
    mirroring the kernel's bf16-matmul mode."""
    if dtype is not None:
        x, w1, w2, w3 = (a.astype(dtype) for a in (x, w1, w2, w3))
    h = jnp.dot(x, w1, preferred_element_type=jnp.float32) + b1
    h = jnp.where(h > 0, h, 0.2 * h)
    h = jnp.dot(h.astype(w2.dtype), w2, preferred_element_type=jnp.float32) + b2
    h = jnp.where(h > 0, h, 0.2 * h)
    return jnp.dot(h.astype(w3.dtype), w3, preferred_element_type=jnp.float32) + b3


if __name__ == "__main__":
    # Small shapes consistent with the module: x is [batch, latent_dim].
    # Deliberately ragged batch (250) and non-lane-aligned output (100) to
    # exercise the batch-pad and output-pad/slice paths.
    batch = 250
    latent_dim = 32
    hidden_dim = 64
    output_dim = 100

    key = jax.random.PRNGKey(0)
    key, kx = jax.random.split(key)
    x = jax.random.normal(kx, (batch, latent_dim), dtype=jnp.float32)
    w1, b1, w2, b2, w3, b3 = init_decoder_params(key, latent_dim, output_dim, hidden_dim)

    ref_f32 = decoder_reference(x, w1, b1, w2, b2, w3, b3)
    ref_bf16 = decoder_reference(x, w1, b1, w2, b2, w3, b3, dtype=jnp.bfloat16)

    # f32-matmul path: tight check against the pure-JAX reference.
    p_f32, O = prepare_decoder_params(w1, b1, w2, b2, w3, b3, use_bf16=False)
    out_f32 = jax.block_until_ready(decoder_forward(x, *p_f32, out_dim=O))
    assert out_f32.shape == (batch, output_dim), out_f32.shape
    assert jnp.allclose(out_f32, ref_f32, atol=1e-5, rtol=1e-5), "f32 mismatch vs reference"

    # bf16-matmul path (default, MXU-native): check against the bf16 reference
    # tightly and the f32 reference loosely.
    p_bf16, O = prepare_decoder_params(w1, b1, w2, b2, w3, b3, use_bf16=True)
    out_bf16 = jax.block_until_ready(decoder_forward(x, *p_bf16, out_dim=O))
    assert out_bf16.shape == (batch, output_dim), out_bf16.shape
    assert jnp.allclose(out_bf16, ref_bf16, atol=2e-2, rtol=2e-2), "bf16 mismatch vs bf16 reference"
    assert jnp.allclose(out_bf16, ref_f32, atol=1e-1, rtol=1e-1), "bf16 mismatch vs f32 reference"

    print("KERNEL_OK")
</pallas_src>

<mosaic_0001>
module attributes {stable_mosaic.version = 11 : i64} {
  func.func @_decoder_kernel(%arg0: i32, %arg1: memref<128x32xf32, #tpu.memory_space<vmem>>, %arg2: memref<32x128xf32, #tpu.memory_space<vmem>>, %arg3: memref<1x128xf32, #tpu.memory_space<vmem>>, %arg4: memref<128x128xf32, #tpu.memory_space<vmem>>, %arg5: memref<1x128xf32, #tpu.memory_space<vmem>>, %arg6: memref<128x128xf32, #tpu.memory_space<vmem>>, %arg7: memref<1x128xf32, #tpu.memory_space<vmem>>, %arg8: memref<128x128xf32, #tpu.memory_space<vmem>>) attributes {dimension_semantics = [#tpu.dimension_semantics<parallel>], iteration_bounds = array<i64: 2>, scalar_prefetch = 0 : i64, scratch_operands = 0 : i64, tpu.core_type = #tpu.core_type<tc>, window_params = [{transform_indices = @transform_0, window_bounds = array<i64: 128, 32>}, {pipeline_mode = #tpu.pipeline_mode<synchronous>, transform_indices = @transform_1, window_bounds = array<i64: 32, 128>}, {pipeline_mode = #tpu.pipeline_mode<synchronous>, transform_indices = @transform_2, window_bounds = array<i64: 1, 128>}, {pipeline_mode = #tpu.pipeline_mode<synchronous>, transform_indices = @transform_3, window_bounds = array<i64: 128, 128>}, {pipeline_mode = #tpu.pipeline_mode<synchronous>, transform_indices = @transform_4, window_bounds = array<i64: 1, 128>}, {pipeline_mode = #tpu.pipeline_mode<synchronous>, transform_indices = @transform_5, window_bounds = array<i64: 128, 128>}, {pipeline_mode = #tpu.pipeline_mode<synchronous>, transform_indices = @transform_6, window_bounds = array<i64: 1, 128>}, {transform_indices = @transform_7, window_bounds = array<i64: 128, 128>}]} {
    %c0 = arith.constant 0 : index
    %c0_0 = arith.constant 0 : index
    %0 = vector.load %arg1[%c0, %c0_0] : memref<128x32xf32, #tpu.memory_space<vmem>>, vector<128x32xf32>
    %c0_1 = arith.constant 0 : index
    %c0_2 = arith.constant 0 : index
    %1 = vector.load %arg2[%c0_1, %c0_2] : memref<32x128xf32, #tpu.memory_space<vmem>>, vector<32x128xf32>
    %cst = arith.constant dense<0.000000e+00> : vector<128x128xf32>
    %2 = tpu.matmul %0, %1, %cst {dimension_numbers = #tpu.dot_dimension_numbers<[1], [0], [0], [1], [0, 0, 1, 1], [], []>} : vector<128x32xf32>, vector<32x128xf32>, vector<128x128xf32> -> vector<128x128xf32>
    %c0_3 = arith.constant 0 : index
    %c0_4 = arith.constant 0 : index
    %3 = vector.load %arg3[%c0_3, %c0_4] : memref<1x128xf32, #tpu.memory_space<vmem>>, vector<1x128xf32>
    %4 = vector.broadcast %3 : vector<1x128xf32> to vector<128x128xf32>
    %5 = arith.addf %2, %4 : vector<128x128xf32>
    %cst_5 = arith.constant 2.000000e-01 : f32
    %6 = vector.broadcast %cst_5 : f32 to vector<128x128xf32>
    %7 = arith.mulf %6, %5 : vector<128x128xf32>
    %8 = arith.maximumf %5, %7 : vector<128x128xf32>
    %c0_6 = arith.constant 0 : index
    %c0_7 = arith.constant 0 : index
    %9 = vector.load %arg4[%c0_6, %c0_7] : memref<128x128xf32, #tpu.memory_space<vmem>>, vector<128x128xf32>
    %cst_8 = arith.constant dense<0.000000e+00> : vector<128x128xf32>
    %10 = tpu.matmul %8, %9, %cst_8 {dimension_numbers = #tpu.dot_dimension_numbers<[1], [0], [0], [1], [0, 0, 1, 1], [], []>} : vector<128x128xf32>, vector<128x128xf32>, vector<128x128xf32> -> vector<128x128xf32>
    %c0_9 = arith.constant 0 : index
    %c0_10 = arith.constant 0 : index
    %11 = vector.load %arg5[%c0_9, %c0_10] : memref<1x128xf32, #tpu.memory_space<vmem>>, vector<1x128xf32>
    %12 = vector.broadcast %11 : vector<1x128xf32> to vector<128x128xf32>
    %13 = arith.addf %10, %12 : vector<128x128xf32>
    %cst_11 = arith.constant 2.000000e-01 : f32
    %14 = vector.broadcast %cst_11 : f32 to vector<128x128xf32>
    %15 = arith.mulf %14, %13 : vector<128x128xf32>
    %16 = arith.maximumf %13, %15 : vector<128x128xf32>
    %c0_12 = arith.constant 0 : index
    %c0_13 = arith.constant 0 : index
    %17 = vector.load %arg6[%c0_12, %c0_13] : memref<128x128xf32, #tpu.memory_space<vmem>>, vector<128x128xf32>
    %cst_14 = arith.constant dense<0.000000e+00> : vector<128x128xf32>
    %18 = tpu.matmul %16, %17, %cst_14 {dimension_numbers = #tpu.dot_dimension_numbers<[1], [0], [0], [1], [0, 0, 1, 1], [], []>} : vector<128x128xf32>, vector<128x128xf32>, vector<128x128xf32> -> vector<128x128xf32>
    %c0_15 = arith.constant 0 : index
    %c0_16 = arith.constant 0 : index
    %19 = vector.load %arg7[%c0_15, %c0_16] : memref<1x128xf32, #tpu.memory_space<vmem>>, vector<1x128xf32>
    %20 = vector.broadcast %19 : vector<1x128xf32> to vector<128x128xf32>
    %21 = arith.addf %18, %20 : vector<128x128xf32>
    %c0_17 = arith.constant 0 : index
    %c0_18 = arith.constant 0 : index
    %22 = vector.load %arg8[%c0_17, %c0_18] : memref<128x128xf32, #tpu.memory_space<vmem>>, vector<128x128xf32>
    tpu.vector_store %arg8[%c0_17, %c0_18], %21 {strides = array<i32>} : memref<128x128xf32, #tpu.memory_space<vmem>>, vector<128x128xf32>,
    return
  }
  func.func @transform_0(%arg0: i32) -> (i32, i32) {
    %c0_i32 = arith.constant 0 : i32
    %c0_i32_0 = arith.constant 0 : i32
    return %arg0, %c0_i32 : i32, i32
  }
  func.func @transform_1(%arg0: i32) -> (i32, i32) {
    %c0_i32 = arith.constant 0 : i32
    %c0_i32_0 = arith.constant 0 : i32
    %c0_i32_1 = arith.constant 0 : i32
    return %c0_i32, %c0_i32_0 : i32, i32
  }
  func.func @transform_2(%arg0: i32) -> (i32, i32) {
    %c0_i32 = arith.constant 0 : i32
    %c0_i32_0 = arith.constant 0 : i32
    %c0_i32_1 = arith.constant 0 : i32
    return %c0_i32, %c0_i32_0 : i32, i32
  }
  func.func @transform_3(%arg0: i32) -> (i32, i32) {
    %c0_i32 = arith.constant 0 : i32
    %c0_i32_0 = arith.constant 0 : i32
    %c0_i32_1 = arith.constant 0 : i32
    return %c0_i32, %c0_i32_0 : i32, i32
  }
  func.func @transform_4(%arg0: i32) -> (i32, i32) {
    %c0_i32 = arith.constant 0 : i32
    %c0_i32_0 = arith.constant 0 : i32
    %c0_i32_1 = arith.constant 0 : i32
    return %c0_i32, %c0_i32_0 : i32, i32
  }
  func.func @transform_5(%arg0: i32) -> (i32, i32) {
    %c0_i32 = arith.constant 0 : i32
    %c0_i32_0 = arith.constant 0 : i32
    %c0_i32_1 = arith.constant 0 : i32
    return %c0_i32, %c0_i32_0 : i32, i32
  }
  func.func @transform_6(%arg0: i32) -> (i32, i32) {
    %c0_i32 = arith.constant 0 : i32
    %c0_i32_0 = arith.constant 0 : i32
    %c0_i32_1 = arith.constant 0 : i32
    return %c0_i32, %c0_i32_0 : i32, i32
  }
  func.func @transform_7(%arg0: i32) -> (i32, i32) {
    %c0_i32 = arith.constant 0 : i32
    %c0_i32_0 = arith.constant 0 : i32
    return %arg0, %c0_i32 : i32, i32
  }
}

</mosaic_0001>

<bundles_post_ra>
// kernel: decoder_forward.1
= control target key start
LH: loop header
LB: loop body
LE: loop exit
PB: predicated region body
PF: predicated region fallthrough
CT: control target
= control target key end

     0   :  { %s1321_s24 = smov 0   ;;  %s1604_s0 = inlined_call_operand.vmem [shape: f32[256,32], index: 0, kind: input, shape index: {}]   ;;  %s1605_s1 = inlined_call_operand.vmem [shape: f32[32,128], index: 1, kind: input, shape index: {}]   ;;  %s1606_s2 = inlined_call_operand.vmem [shape: f32[1,128], index: 2, kind: input, shape index: {}]   ;;  %s1607_s3 = inlined_call_operand.vmem [shape: f32[128,128], index: 3, kind: input, shape index: {}]   ;;  %s1608_s4 = inlined_call_operand.vmem [shape: f32[1,128], index: 4, kind: input, shape index: {}]   ;;  %s1609_s5 = inlined_call_operand.vmem [shape: f32[128,128], index: 5, kind: input, shape index: {}]   ;;  %s1610_s6 = inlined_call_operand.vmem [shape: f32[1,128], index: 6, kind: input, shape index: {}]   ;;  %s1611_s7 = inlined_call_operand.vmem [shape: f32[256,128], index: 7, kind: output, shape index: {}]  }
   0x1 LB: > { %s975_s25 = sadd.s32 4294967295, %s1279_s24   ;;  %p979_p0 = scmp.ge.s32.totalorder %s1279_s24, 1  ;;  %s1279_s24 = sphi %s1321_s24, %s17_s24  }
   0x2   : > { %p238_p1 = scmp.lt.s32.totalorder %s1279_s24, 3 }
   0x4   : > { %p239_p2 = pnand %p979_p0, %p238_p1 }
   0x5   : > { %s980_s30 = sshll.u32 (!%p239_p2), %s975_s25, 4 }
   0x6   : > { %242 = sbr.rel (%p239_p2) target bundleno = 650 (0x28a), region = 48  ;;  %p271_p3 = scmp.lt.s32.totalorder (!%p239_p2), %s980_s30, 31 }
   0xb   : > { %v301_v0 = vld [vmem:[%s1605_s1 + $0x18] sm:$0xff]  ;;  %v300_v1 = vld [vmem:[%s1605_s1 + $0x10] sm:$0xff]  ;;  %v299_v4 = vld [vmem:[%s1605_s1 + $0x8] sm:$0xff]  ;;  %s1613_s30 = smov (!%p271_p3, %s980_s30), 31  ;;  %vm309_vm0 = vcmask 261120  }
   0xc   : > { %1089 = vmatprep.subr.mxu0 %v301_v0  ;;  %v550_v2 = vld [vmem:[%s1607_s3 + $0x78] sm:$0xff]  ;;  %v549_v3 = vld [vmem:[%s1607_s3 + $0x70] sm:$0xff]  ;;  %v548_v5 = vld [vmem:[%s1607_s3 + $0x68] sm:$0xff]  ;;  %s981_s18 = sshll.u32 %s1613_s30, 3 }
   0xd   : > { %1090 = vmatpush3.msra.mxu0 %v301_v0  ;;  %1121 = vmatprep.subr.mxu1 %v550_v2  ;;  %v298_v6 = vld [vmem:[%s1605_s1] sm:$0xff]  ;;  %s1358_s21 = scalar_lea.vmem %s1604_s0, %s981_s18  ;;  %v546_v11 = vld [vmem:[%s1607_s3 + $0x58] sm:$0xff]  ;;  %v545_v13 = vld [vmem:[%s1607_s3 + $0x50] sm:$0xff]  ;;  %s1583_s29 = scalar_lea.vmem %s1611_s7, %s981_s18 }
   0xe   : > { %1091 = vmatprep.subr.mxu0 %v300_v1  ;;  %1122 = vmatpush3.msra.mxu1 %v550_v2  ;;  %v547_v7 = vld [vmem:[%s1607_s3 + $0x60] sm:$0xff]  ;;  %v283_v9 = vld [vmem:[%s1358_s21 + $0x8] sm:$0xff]  ;;  %v284_v10 = vld [vmem:[%s1358_s21 + $0x10] sm:$0xff] }
   0xf   : > { %1092 = vmatpush3.msra.mxu0 %v300_v1  ;;  %1123 = vmatprep.subr.mxu1 %v549_v3  ;;  %v282_v8 = vld [vmem:[%s1358_s21] sm:$0xff]  ;;  %v285_v12 = vld [vmem:[%s1358_s21 + $0x18] sm:$0xff]  ;;  %v544_v15 = vld [vmem:[%s1607_s3 + $0x48] sm:$0xff] }
  0x10   : > { %1093 = vmatprep.subr.mxu0 %v299_v4  ;;  %1124 = vmatpush3.msra.mxu1 %v549_v3  ;;  %v286_v14 = vld [vmem:[%s1358_s21 + $0x20] sm:$0xff]  ;;  %v287_v16 = vld [vmem:[%s1358_s21 + $0x28] sm:$0xff]  ;;  %v288_v18 = vld [vmem:[%s1358_s21 + $0x30] sm:$0xff] }
  0x11   : > { %1094 = vmatpush3.msra.mxu0 %v299_v4  ;;  %1125 = vmatprep.subr.mxu1 %v548_v5  ;;  %v543_v17 = vld [vmem:[%s1607_s3 + $0x40] sm:$0xff]  ;;  %v542_v19 = vld [vmem:[%s1607_s3 + $0x38] sm:$0xff]  ;;  %v541_v21 = vld [vmem:[%s1607_s3 + $0x30] sm:$0xff] }
  0x12   : > { %1095 = vmatprep.subr.mxu0 %v298_v6  ;;  %1126 = vmatpush3.msra.mxu1 %v548_v5  ;;  %v289_v20 = vld [vmem:[%s1358_s21 + $0x38] sm:$0xff]  ;;  %v290_v22 = vld [vmem:[%s1358_s21 + $0x40] sm:$0xff]  ;;  %v540_v23 = vld [vmem:[%s1607_s3 + $0x28] sm:$0xff] }
  0x13   : > { %1096 = vmatpush3.msra.mxu0 %v298_v6  ;;  %1097 = vmatprep.mubr.msk.f32.mxu0 %vm309_vm0, %v282_v8  ;;  %v291_v24 = vld [vmem:[%s1358_s21 + $0x48] sm:$0xff]  ;;  %v292_v25 = vld [vmem:[%s1358_s21 + $0x50] sm:$0xff]  ;;  %v293_v26 = vld [vmem:[%s1358_s21 + $0x58] sm:$0xff] }
  0x14   : > { %1098 = vmatmul.mubr.msk.f32.vlgmr.msra.gmra.mxu0 %vm309_vm0, %v283_v9  ;;  %1127 = vmatprep.subr.mxu1 %v547_v7  ;;  %v294_v27 = vld [vmem:[%s1358_s21 + $0x60] sm:$0xff]  ;;  %v295_v28 = vld [vmem:[%s1358_s21 + $0x68] sm:$0xff]  ;;  %v296_v29 = vld [vmem:[%s1358_s21 + $0x70] sm:$0xff] }
  0x15   : > { %1100 = vmatprep.mubr.msk.f32.mxu0 %vm309_vm0, %v284_v10  ;;  %1128 = vmatpush3.msra.mxu1 %v547_v7  ;;  %v297_v30 = vld [vmem:[%s1358_s21 + $0x78] sm:$0xff]  ;;  %v539_v31 = vld [vmem:[%s1607_s3 + $0x20] sm:$0xff]  ;;  %v537_v33 = vld [vmem:[%s1607_s3 + $0x10] sm:$0xff] }
  0x16   : > { %1129 = vmatprep.subr.mxu1 %v546_v11  ;;  %v538_v32 = vld [vmem:[%s1607_s3 + $0x18] sm:$0xff]  ;;  %v536_v34 = vld [vmem:[%s1607_s3 + $0x8] sm:$0xff]  ;;  %v535_v35 = vld [vmem:[%s1607_s3] sm:$0xff] }
  0x17   : > { %1130 = vmatpush3.msra.mxu1 %v546_v11  ;;  %v750_v36 = vld [vmem:[%s1609_s5 + $0x78] sm:$0xff]  ;;  %v749_v37 = vld [vmem:[%s1609_s5 + $0x70] sm:$0xff]  ;;  %v1440_v38 = vld [vmem:[%s1609_s5 + $0x68] sm:$0xff] }
  0x18   : > { %1101 = vmatmul.mubr.msk.f32.gmra.mxu0 %vm309_vm0, %v285_v12  ;;  %1131 = vmatprep.subr.mxu1 %v545_v13  ;;  %v1445_v39 = vld [vmem:[%s1609_s5 + $0x60] sm:$0xff]  ;;  %v1452_v40 = vld [vmem:[%s1609_s5 + $0x58] sm:$0xff]  ;;  %v1459_v41 = vld [vmem:[%s1609_s5 + $0x50] sm:$0xff] }
  0x19   : > { %1103 = vmatprep.mubr.msk.f32.mxu0 %vm309_vm0, %v286_v14  ;;  %1132 = vmatpush3.msra.mxu1 %v545_v13  ;;  %v1466_v42 = vld [vmem:[%s1609_s5 + $0x48] sm:$0xff]  ;;  %v1473_v43 = vld [vmem:[%s1609_s5 + $0x40] sm:$0xff]  ;;  %v1480_v44 = vld [vmem:[%s1609_s5 + $0x38] sm:$0xff] }
  0x1a   : > { %1133 = vmatprep.subr.mxu1 %v544_v15  ;;  %1177 = vmatprep.subr.mxu0 %v750_v36  ;;  %v1487_v45 = vld [vmem:[%s1609_s5 + $0x30] sm:$0xff]  ;;  %v1494_v46 = vld [vmem:[%s1609_s5 + $0x28] sm:$0xff]  ;;  %v1503_v47 = vld [vmem:[%s1606_s2] ss:$0 sm:$0xff] }
  0x1b   : > { %1134 = vmatpush3.msra.mxu1 %v544_v15  ;;  %1178 = vmatpush3.msra.mxu0 %v750_v36 }
  0x1c   : > { %1104 = vmatmul.mubr.msk.f32.gmra.mxu0 %vm309_vm0, %v287_v16  ;;  %1135 = vmatprep.subr.mxu1 %v543_v17 }
  0x1d   : > { %1106 = vmatprep.mubr.msk.f32.mxu0 %vm309_vm0, %v288_v18  ;;  %1136 = vmatpush3.msra.mxu1 %v543_v17 }
  0x1e   : > { %1137 = vmatprep.subr.mxu1 %v542_v19  ;;  %1179 = vmatprep.subr.mxu0 %v749_v37 }
  0x1f   : > { %1138 = vmatpush3.msra.mxu1 %v542_v19  ;;  %1180 = vmatpush3.msra.mxu0 %v749_v37 }
  0x20   : > { %1107 = vmatmul.mubr.msk.f32.gmra.mxu0 %vm309_vm0, %v289_v20  ;;  %1139 = vmatprep.subr.mxu1 %v541_v21 }
  0x21   : > { %1109 = vmatprep.mubr.msk.f32.mxu0 %vm309_vm0, %v290_v22  ;;  %1140 = vmatpush3.msra.mxu1 %v541_v21 }
  0x22   : > { %1141 = vmatprep.subr.mxu1 %v540_v23  ;;  %1181 = vmatprep.subr.mxu0 %v1440_v38 }
  0x23   : > { %1142 = vmatpush3.msra.mxu1 %v540_v23  ;;  %1182 = vmatpush3.msra.mxu0 %v1440_v38 }
  0x24   : > { %1110 = vmatmul.mubr.msk.f32.gmra.mxu0 %vm309_vm0, %v291_v24  ;;  %1143 = vmatprep.subr.mxu1 %v539_v31 }
  0x25   : > { %1112 = vmatprep.mubr.msk.f32.mxu0 %vm309_vm0, %v292_v25  ;;  %1144 = vmatpush3.msra.mxu1 %v539_v31 }
  0x26   : > { %1145 = vmatprep.subr.mxu1 %v538_v32  ;;  %1183 = vmatprep.subr.mxu0 %v1445_v39 }
  0x27   : > { %1146 = vmatpush3.msra.mxu1 %v538_v32  ;;  %1184 = vmatpush3.msra.mxu0 %v1445_v39 }
  0x28   : > { %1113 = vmatmul.mubr.msk.f32.gmra.mxu0 %vm309_vm0, %v293_v26  ;;  %1147 = vmatprep.subr.mxu1 %v537_v33 }
  0x29   : > { %1115 = vmatprep.mubr.msk.f32.mxu0 %vm309_vm0, %v294_v27  ;;  %1148 = vmatpush3.msra.mxu1 %v537_v33 }
  0x2a   : > { %1149 = vmatprep.subr.mxu1 %v536_v34  ;;  %1185 = vmatprep.subr.mxu0 %v1452_v40 }
  0x2b   : > { %1150 = vmatpush3.msra.mxu1 %v536_v34  ;;  %1186 = vmatpush3.msra.mxu0 %v1452_v40 }
  0x2c   : > { %1116 = vmatmul.mubr.msk.f32.gmra.mxu0 %vm309_vm0, %v295_v28  ;;  %1151 = vmatprep.subr.mxu1 %v535_v35 }
  0x2d   : > { %1118 = vmatprep.mubr.msk.f32.mxu0 %vm309_vm0, %v296_v29  ;;  %1152 = vmatpush3.msra.mxu1 %v535_v35 }
  0x2e   : > { %1233 = vmatprep.subr.mxu1 %v750_v36  ;;  %1187 = vmatprep.subr.mxu0 %v1459_v41 }
  0x2f   : > { %1188 = vmatpush3.msra.mxu0 %v1459_v41 }
  0x30   : > { %1119 = vmatmul.mubr.msk.f32.gmra.mxu0 %vm309_vm0, %v297_v30  ;;  %1189 = vmatprep.subr.mxu0 %v1466_v42 }
  0x31   : > { %1190 = vmatpush3.msra.mxu0 %v1466_v42 }
  0x32   : > { %1191 = vmatprep.subr.mxu0 %v1473_v43 }
  0x33   : > { %1192 = vmatpush3.msra.mxu0 %v1473_v43 }
  0x34   : > { %1193 = vmatprep.subr.mxu0 %v1480_v44 }
  0x35   : > { %1194 = vmatpush3.msra.mxu0 %v1480_v44 }
  0x36   : > { %1195 = vmatprep.subr.mxu0 %v1487_v45 }
  0x37   : > { %1196 = vmatpush3.msra.mxu0 %v1487_v45 }
  0x38   : > { %1197 = vmatprep.subr.mxu0 %v1494_v46 }
  0x39   : > { %1198 = vmatpush3.msra.mxu0 %v1494_v46 }
  0xd4   : > { %v1099_v48 = vpop.f32.mrf.mxu0 }
  0xd5   : > { %v430_v49 = vadd.f32 %v1099_v48, %v1503_v47 }
  0xd6   : > { %v424_v50 = vpop.f32.mrf.mxu0 }
  0xd7   : > { %v425_v51 = vadd.f32 %v1503_v47, %v424_v50  ;;  %v504_v52 = vmul.f32 0.2, %v430_v49 }
  0xd8   : > { %v1102_v53 = vpop.f32.mrf.mxu0 }
  0xd9   : > { %v440_v54 = vadd.f32 %v1102_v53, %v1503_v47  ;;  %v503_v55 = vmul.f32 0.2, %v425_v51  ;;  %v520_v59 = vmax.f32 %v430_v49, %v504_v52  ;;  %v735_v52 = vld [vmem:[%s1609_s5] sm:$0xff] }
  0xda   : > { %v434_v56 = vpop.f32.mrf.mxu0  ;;  %v1557_v53 = vld [vmem:[%s1608_s4] ss:$0 sm:$0xff] }
  0xdb   : > { %v435_v57 = vadd.f32 %v1503_v47, %v434_v56  ;;  %v519_v58 = vmax.f32 %v425_v51, %v503_v55  ;;  %v506_v60 = vmul.f32 0.2, %v440_v54  ;;  %v736_v51 = vld [vmem:[%s1609_s5 + $0x8] sm:$0xff] }
  0xdc   : > { %v1105_v61 = vpop.f32.mrf.mxu0 }
  0xdd   : > { %v505_v62 = vmul.f32 0.2, %v435_v57  ;;  %v450_v63 = vadd.f32 %v1105_v61, %v1503_v47  ;;  %1153 = vmatprep.mubr.f32.mxu1 %v519_v58  ;;  %v522_v3 = vmax.f32 %v440_v54, %v506_v60 }
  0xde   : > { %v444_v0 = vpop.f32.mrf.mxu0  ;;  %1154 = vmatmul.mubr.f32.vlgmr.msra.gmra.mxu1 %v520_v59 }
  0xdf   : > { %v521_v1 = vmax.f32 %v435_v57, %v505_v62  ;;  %v445_v2 = vadd.f32 %v1503_v47, %v444_v0  ;;  %1249 = vmatpush3.msra.mxu1 %v750_v36  ;;  %v508_v4 = vmul.f32 0.2, %v450_v63 }
  0xe0   : > { %v1108_v5 = vpop.f32.mrf.mxu0  ;;  %1234 = vmatprep.subr.mxu1 %v749_v37 }
  0xe1   : > { %v507_v6 = vmul.f32 0.2, %v445_v2  ;;  %v460_v7 = vadd.f32 %v1108_v5, %v1503_v47  ;;  %1156 = vmatprep.mubr.f32.mxu1 %v521_v1  ;;  %1250 = vmatpush3.msra.mxu1 %v749_v37  ;;  %v524_v11 = vmax.f32 %v450_v63, %v508_v4 }
  0xe2   : > { %v454_v8 = vpop.f32.mrf.mxu0  ;;  %1157 = vmatmul.mubr.f32.gmra.mxu1 %v522_v3  ;;  %1235 = vmatprep.subr.mxu1 %v1440_v38 }
  0xe3   : > { %v523_v9 = vmax.f32 %v445_v2, %v507_v6  ;;  %v455_v10 = vadd.f32 %v1503_v47, %v454_v8  ;;  %1251 = vmatpush3.msra.mxu1 %v1440_v38  ;;  %v510_v12 = vmul.f32 0.2, %v460_v7 }
  0xe4   : > { %v1111_v13 = vpop.f32.mrf.mxu0  ;;  %1236 = vmatprep.subr.mxu1 %v1445_v39 }
  0xe5   : > { %v509_v14 = vmul.f32 0.2, %v455_v10  ;;  %v470_v15 = vadd.f32 %v1111_v13, %v1503_v47  ;;  %1159 = vmatprep.mubr.f32.mxu1 %v523_v9  ;;  %1252 = vmatpush3.msra.mxu1 %v1445_v39  ;;  %v526_v19 = vmax.f32 %v460_v7, %v510_v12 }
  0xe6   : > { %v464_v16 = vpop.f32.mrf.mxu0  ;;  %1160 = vmatmul.mubr.f32.gmra.mxu1 %v524_v11  ;;  %1237 = vmatprep.subr.mxu1 %v1452_v40 }
  0xe7   : > { %v525_v17 = vmax.f32 %v455_v10, %v509_v14  ;;  %v465_v18 = vadd.f32 %v1503_v47, %v464_v16  ;;  %1253 = vmatpush3.msra.mxu1 %v1452_v40  ;;  %v512_v20 = vmul.f32 0.2, %v470_v15 }
  0xe8   : > { %v1114_v21 = vpop.f32.mrf.mxu0  ;;  %1238 = vmatprep.subr.mxu1 %v1459_v41 }
  0xe9   : > { %v511_v22 = vmul.f32 0.2, %v465_v18  ;;  %v480_v23 = vadd.f32 %v1114_v21, %v1503_v47  ;;  %1162 = vmatprep.mubr.f32.mxu1 %v525_v17  ;;  %1254 = vmatpush3.msra.mxu1 %v1459_v41  ;;  %v528_v27 = vmax.f32 %v470_v15, %v512_v20 }
  0xea   : > { %v474_v24 = vpop.f32.mrf.mxu0  ;;  %1163 = vmatmul.mubr.f32.gmra.mxu1 %v526_v19  ;;  %1239 = vmatprep.subr.mxu1 %v1466_v42 }
  0xeb   : > { %v527_v25 = vmax.f32 %v465_v18, %v511_v22  ;;  %v475_v26 = vadd.f32 %v1503_v47, %v474_v24  ;;  %1255 = vmatpush3.msra.mxu1 %v1466_v42  ;;  %v514_v28 = vmul.f32 0.2, %v480_v23 }
  0xec   : > { %v1117_v29 = vpop.f32.mrf.mxu0  ;;  %1240 = vmatprep.subr.mxu1 %v1473_v43 }
  0xed   : > { %v513_v30 = vmul.f32 0.2, %v475_v26  ;;  %v490_v31 = vadd.f32 %v1117_v29, %v1503_v47  ;;  %1165 = vmatprep.mubr.f32.mxu1 %v527_v25  ;;  %1256 = vmatpush3.msra.mxu1 %v1473_v43  ;;  %v530_v35 = vmax.f32 %v480_v23, %v514_v28 }
  0xee   : > { %v484_v32 = vpop.f32.mrf.mxu0  ;;  %1166 = vmatmul.mubr.f32.gmra.mxu1 %v528_v27  ;;  %1241 = vmatprep.subr.mxu1 %v1480_v44 }
  0xef   : > { %v529_v33 = vmax.f32 %v475_v26, %v513_v30  ;;  %v485_v34 = vadd.f32 %v1503_v47, %v484_v32  ;;  %1257 = vmatpush3.msra.mxu1 %v1480_v44  ;;  %v516_v36 = vmul.f32 0.2, %v490_v31 }
  0xf0   : > { %v1120_v37 = vpop.f32.mrf.mxu0  ;;  %1242 = vmatprep.subr.mxu1 %v1487_v45 }
  0xf1   : > { %v515_v38 = vmul.f32 0.2, %v485_v34  ;;  %v500_v39 = vadd.f32 %v1120_v37, %v1503_v47  ;;  %1168 = vmatprep.mubr.f32.mxu1 %v529_v33  ;;  %1258 = vmatpush3.msra.mxu1 %v1487_v45  ;;  %v532_v43 = vmax.f32 %v490_v31, %v516_v36  ;;  %v739_v45 = vld [vmem:[%s1609_s5 + $0x20] sm:$0xff] }
  0xf2   : > { %v494_v40 = vpop.f32.mrf.mxu0  ;;  %1169 = vmatmul.mubr.f32.gmra.mxu1 %v530_v35  ;;  %1243 = vmatprep.subr.mxu1 %v1494_v46 }
  0xf3   : > { %v531_v41 = vmax.f32 %v485_v34, %v515_v38  ;;  %v495_v42 = vadd.f32 %v1503_v47, %v494_v40  ;;  %1259 = vmatpush3.msra.mxu1 %v1494_v46  ;;  %v518_v44 = vmul.f32 0.2, %v500_v39  ;;  %1199 = vmatprep.subr.mxu0 %v739_v45  ;;  %v738_v46 = vld [vmem:[%s1609_s5 + $0x18] sm:$0xff]  ;;  %v737_v47 = vld [vmem:[%s1609_s5 + $0x10] sm:$0xff] }
  0xf4   : > { %1244 = vmatprep.subr.mxu1 %v739_v45  ;;  %1200 = vmatpush3.msra.mxu0 %v739_v45 }
  0xf5   : > { %v517_v48 = vmul.f32 0.2, %v495_v42  ;;  %1171 = vmatprep.mubr.f32.mxu1 %v531_v41  ;;  %v534_v50 = vmax.f32 %v500_v39, %v518_v44  ;;  %1260 = vmatpush3.msra.mxu1 %v739_v45 }
  0xf6   : > { %1172 = vmatmul.mubr.f32.gmra.mxu1 %v532_v43  ;;  %1201 = vmatprep.subr.mxu0 %v738_v46 }
  0xf7   : > { %v533_v49 = vmax.f32 %v495_v42, %v517_v48  ;;  %1245 = vmatprep.subr.mxu1 %v738_v46  ;;  %1202 = vmatpush3.msra.mxu0 %v738_v46 }
  0xf8   : > { %1261 = vmatpush3.msra.mxu1 %v738_v46  ;;  %1203 = vmatprep.subr.mxu0 %v737_v47 }
  0xf9   : > { %1174 = vmatprep.mubr.f32.mxu1 %v533_v49  ;;  %1246 = vmatprep.subr.mxu1 %v737_v47 }
  0xfa   : > { %1175 = vmatmul.mubr.f32.gmra.mxu1 %v534_v50  ;;  %1204 = vmatpush3.msra.mxu0 %v737_v47 }
  0xfb   : > { %1262 = vmatpush3.msra.mxu1 %v737_v47  ;;  %1205 = vmatprep.subr.mxu0 %v736_v51 }
  0xfc   : > { %1247 = vmatprep.subr.mxu1 %v736_v51  ;;  %1206 = vmatpush3.msra.mxu0 %v736_v51 }
  0xfd   : > { %1263 = vmatpush3.msra.mxu1 %v736_v51  ;;  %1207 = vmatprep.subr.mxu0 %v735_v52 }
  0xfe   : > { %1248 = vmatprep.subr.mxu1 %v735_v52  ;;  %1208 = vmatpush3.msra.mxu0 %v735_v52 }
  0xff   : > { %1264 = vmatpush3.msra.mxu1 %v735_v52 }
 0x19e   : > { %v1155_v54 = vpop.f32.mrf.mxu1 }
 0x19f   : > { %v630_v55 = vadd.f32 %v1155_v54, %v1557_v53 }
 0x1a0   : > { %v624_v56 = vpop.f32.mrf.mxu1 }
 0x1a1   : > { %v625_v57 = vadd.f32 %v1557_v53, %v624_v56  ;;  %v704_v58 = vmul.f32 0.2, %v630_v55 }
 0x1a2   : > { %v1158_v59 = vpop.f32.mrf.mxu1 }
 0x1a3   : > { %v703_v60 = vmul.f32 0.2, %v625_v57  ;;  %v640_v61 = vadd.f32 %v1158_v59, %v1557_v53  ;;  %v720_v1 = vmax.f32 %v630_v55, %v704_v58  ;;  %v1002_v55 = vld [vmem:[%s1610_s6] ss:$0 sm:$0xff] }
 0x1a4   : > { %v634_v62 = vpop.f32.mrf.mxu1 }
 0x1a5   : > { %v719_v63 = vmax.f32 %v625_v57, %v703_v60  ;;  %v635_v0 = vadd.f32 %v1557_v53, %v634_v62  ;;  %v706_v2 = vmul.f32 0.2, %v640_v61 }
 0x1a6   : > { %v1161_v3 = vpop.f32.mrf.mxu1 }
 0x1a7   : > { %v705_v4 = vmul.f32 0.2, %v635_v0  ;;  %v650_v5 = vadd.f32 %v1161_v3, %v1557_v53  ;;  %1209 = vmatprep.mubr.f32.mxu0 %v719_v63  ;;  %v722_v9 = vmax.f32 %v640_v61, %v706_v2 }
 0x1a8   : > { %v644_v6 = vpop.f32.mrf.mxu1  ;;  %1210 = vmatmul.mubr.f32.vlgmr.msra.gmra.mxu0 %v720_v1 }
 0x1a9   : > { %v721_v7 = vmax.f32 %v635_v0, %v705_v4  ;;  %v645_v8 = vadd.f32 %v1557_v53, %v644_v6  ;;  %v708_v10 = vmul.f32 0.2, %v650_v5 }
 0x1aa   : > { %v1164_v11 = vpop.f32.mrf.mxu1 }
 0x1ab   : > { %v707_v12 = vmul.f32 0.2, %v645_v8  ;;  %v660_v13 = vadd.f32 %v1164_v11, %v1557_v53  ;;  %1212 = vmatprep.mubr.f32.mxu0 %v721_v7  ;;  %v724_v17 = vmax.f32 %v650_v5, %v708_v10 }
 0x1ac   : > { %v654_v14 = vpop.f32.mrf.mxu1  ;;  %1213 = vmatmul.mubr.f32.gmra.mxu0 %v722_v9 }
 0x1ad   : > { %v723_v15 = vmax.f32 %v645_v8, %v707_v12  ;;  %v655_v16 = vadd.f32 %v1557_v53, %v654_v14  ;;  %v710_v18 = vmul.f32 0.2, %v660_v13 }
 0x1ae   : > { %v1167_v19 = vpop.f32.mrf.mxu1 }
 0x1af   : > { %v709_v20 = vmul.f32 0.2, %v655_v16  ;;  %v670_v21 = vadd.f32 %v1167_v19, %v1557_v53  ;;  %1215 = vmatprep.mubr.f32.mxu0 %v723_v15  ;;  %v726_v25 = vmax.f32 %v660_v13, %v710_v18 }
 0x1b0   : > { %v664_v22 = vpop.f32.mrf.mxu1  ;;  %1216 = vmatmul.mubr.f32.gmra.mxu0 %v724_v17 }
 0x1b1   : > { %v725_v23 = vmax.f32 %v655_v16, %v709_v20  ;;  %v665_v24 = vadd.f32 %v1557_v53, %v664_v22  ;;  %v712_v26 = vmul.f32 0.2, %v670_v21 }
 0x1b2   : > { %v1170_v27 = vpop.f32.mrf.mxu1 }
 0x1b3   : > { %v711_v28 = vmul.f32 0.2, %v665_v24  ;;  %v680_v29 = vadd.f32 %v1170_v27, %v1557_v53  ;;  %1218 = vmatprep.mubr.f32.mxu0 %v725_v23  ;;  %v728_v33 = vmax.f32 %v670_v21, %v712_v26 }
 0x1b4   : > { %v674_v30 = vpop.f32.mrf.mxu1  ;;  %1219 = vmatmul.mubr.f32.gmra.mxu0 %v726_v25 }
 0x1b5   : > { %v727_v31 = vmax.f32 %v665_v24, %v711_v28  ;;  %v675_v32 = vadd.f32 %v1557_v53, %v674_v30  ;;  %v714_v34 = vmul.f32 0.2, %v680_v29 }
 0x1b6   : > { %v1173_v35 = vpop.f32.mrf.mxu1 }
 0x1b7   : > { %v713_v36 = vmul.f32 0.2, %v675_v32  ;;  %v690_v37 = vadd.f32 %v1173_v35, %v1557_v53  ;;  %1221 = vmatprep.mubr.f32.mxu0 %v727_v31  ;;  %v730_v41 = vmax.f32 %v680_v29, %v714_v34 }
 0x1b8   : > { %v684_v38 = vpop.f32.mrf.mxu1  ;;  %1222 = vmatmul.mubr.f32.gmra.mxu0 %v728_v33 }
 0x1b9   : > { %v729_v39 = vmax.f32 %v675_v32, %v713_v36  ;;  %v685_v40 = vadd.f32 %v1557_v53, %v684_v38  ;;  %v716_v42 = vmul.f32 0.2, %v690_v37 }
 0x1ba   : > { %v1176_v43 = vpop.f32.mrf.mxu1 }
 0x1bb   : > { %v715_v44 = vmul.f32 0.2, %v685_v40  ;;  %v700_v48 = vadd.f32 %v1176_v43, %v1557_v53  ;;  %1224 = vmatprep.mubr.f32.mxu0 %v729_v39  ;;  %v732_v46 = vmax.f32 %v690_v37, %v716_v42 }
 0x1bc   : > { %v694_v49 = vpop.f32.mrf.mxu1  ;;  %1225 = vmatmul.mubr.f32.gmra.mxu0 %v730_v41 }
 0x1bd   : > { %v731_v50 = vmax.f32 %v685_v40, %v715_v44  ;;  %v695_v45 = vadd.f32 %v1557_v53, %v694_v49  ;;  %v718_v47 = vmul.f32 0.2, %v700_v48 }
 0x1bf   : > { %v717_v51 = vmul.f32 0.2, %v695_v45  ;;  %1227 = vmatprep.mubr.f32.mxu0 %v731_v50  ;;  %v734_v54 = vmax.f32 %v700_v48, %v718_v47 }
 0x1c0   : > { %1228 = vmatmul.mubr.f32.gmra.mxu0 %v732_v46 }
 0x1c1   : > { %v733_v52 = vmax.f32 %v695_v45, %v717_v51 }
 0x1c3   : > { %1230 = vmatprep.mubr.f32.mxu1 %v733_v52 }
 0x1c4   : > { %1231 = vmatmul.mubr.f32.vlgmr.msra.gmra.mxu1 %v734_v54 }
 0x268   : > { %v1211_v53 = vpop.f32.mrf.mxu0 }
 0x269   : > { %v830_v56 = vadd.f32 %v1211_v53, %v1002_v55 }
 0x26a   : > { %v824_v57 = vpop.f32.mrf.mxu0 }
 0x26b   : > { %904 = vst [vmem:[%s1583_s29 + $0x8] sm:$0xff] %v830_v56  ;;  %v825_v58 = vadd.f32 %v1002_v55, %v824_v57 }
 0x26c   : > { %v1214_v59 = vpop.f32.mrf.mxu0 }
 0x26d   : > { %903 = vst [vmem:[%s1583_s29] sm:$0xff] %v825_v58  ;;  %v840_v60 = vadd.f32 %v1214_v59, %v1002_v55 }
 0x26e   : > { %v834_v61 = vpop.f32.mrf.mxu0 }
 0x26f   : > { %906 = vst [vmem:[%s1583_s29 + $0x18] sm:$0xff] %v840_v60  ;;  %v835_v62 = vadd.f32 %v1002_v55, %v834_v61 }
 0x270   : > { %v1217_v63 = vpop.f32.mrf.mxu0 }
 0x271   : > { %905 = vst [vmem:[%s1583_s29 + $0x10] sm:$0xff] %v835_v62  ;;  %v850_v0 = vadd.f32 %v1217_v63, %v1002_v55 }
 0x272   : > { %v844_v1 = vpop.f32.mrf.mxu0 }
 0x273   : > { %908 = vst [vmem:[%s1583_s29 + $0x28] sm:$0xff] %v850_v0  ;;  %v845_v2 = vadd.f32 %v1002_v55, %v844_v1 }
 0x274   : > { %v1220_v3 = vpop.f32.mrf.mxu0 }
 0x275   : > { %907 = vst [vmem:[%s1583_s29 + $0x20] sm:$0xff] %v845_v2  ;;  %v860_v4 = vadd.f32 %v1220_v3, %v1002_v55 }
 0x276   : > { %v854_v5 = vpop.f32.mrf.mxu0 }
 0x277   : > { %910 = vst [vmem:[%s1583_s29 + $0x38] sm:$0xff] %v860_v4  ;;  %v855_v6 = vadd.f32 %v1002_v55, %v854_v5 }
 0x278   : > { %v1223_v7 = vpop.f32.mrf.mxu0 }
 0x279   : > { %909 = vst [vmem:[%s1583_s29 + $0x30] sm:$0xff] %v855_v6  ;;  %v870_v8 = vadd.f32 %v1223_v7, %v1002_v55 }
 0x27a   : > { %v864_v9 = vpop.f32.mrf.mxu0 }
 0x27b   : > { %912 = vst [vmem:[%s1583_s29 + $0x48] sm:$0xff] %v870_v8  ;;  %v865_v10 = vadd.f32 %v1002_v55, %v864_v9 }
 0x27c   : > { %v1226_v11 = vpop.f32.mrf.mxu0 }
 0x27d   : > { %911 = vst [vmem:[%s1583_s29 + $0x40] sm:$0xff] %v865_v10  ;;  %v880_v12 = vadd.f32 %v1226_v11, %v1002_v55 }
 0x27e   : > { %v874_v13 = vpop.f32.mrf.mxu0 }
 0x27f   : > { %914 = vst [vmem:[%s1583_s29 + $0x58] sm:$0xff] %v880_v12  ;;  %v875_v14 = vadd.f32 %v1002_v55, %v874_v13 }
 0x280   : > { %v1229_v15 = vpop.f32.mrf.mxu0 }
 0x281   : > { %913 = vst [vmem:[%s1583_s29 + $0x50] sm:$0xff] %v875_v14  ;;  %v890_v16 = vadd.f32 %v1229_v15, %v1002_v55 }
 0x282   : > { %v884_v17 = vpop.f32.mrf.mxu0 }
 0x283   : > { %916 = vst [vmem:[%s1583_s29 + $0x68] sm:$0xff] %v890_v16  ;;  %v885_v18 = vadd.f32 %v1002_v55, %v884_v17 }
 0x284   : > { %v1232_v19 = vpop.f32.mrf.mxu1 }
 0x285   : > { %915 = vst [vmem:[%s1583_s29 + $0x60] sm:$0xff] %v885_v18  ;;  %v900_v20 = vadd.f32 %v1232_v19, %v1002_v55 }
 0x286   : > { %v894_v21 = vpop.f32.mrf.mxu1 }
 0x287   : > { %918 = vst [vmem:[%s1583_s29 + $0x78] sm:$0xff] %v900_v20  ;;  %v895_v22 = vadd.f32 %v1002_v55, %v894_v21 }
 0x289   : > { %917 = vst [vmem:[%s1583_s29 + $0x70] sm:$0xff] %v895_v22 }
 0x28a PF: > { %s17_s24 = sadd.s32 1, %s1279_s24  }
 0x28b   : > { %p14_p4 = scmp.ge.s32.totalorder %s17_s24, 4  }
 0x28d   :  { %16 = sbr.rel (!%p14_p4) target bundleno = 1 (0x1), region = 78 }

</bundles_post_ra>
